<compile_context>
chip_gen: v6e
topology: v6e:2x2x1
jax: 0.10.0
libtpu: 0.0.40
codegen_flags: <defaults>
</compile_context>

<pallas_src>
import functools

import numpy as np
import jax
import jax.numpy as jnp
from jax.experimental import pallas as pl
from jax.experimental.pallas import tpu as pltpu


def mixffn_kernel(x_ref, w1t_ref, b1_ref, wmask_ref, bconv_ref, w3t_ref, b3_ref,
                  o_ref, buf_ref, *, BT, N, D, C, OFFS, PAD):
    # x_ref: (BT, N, D), o_ref: (BT, N, D); parameter blocks are full arrays.
    M = BT * N
    half = C // 2

    # ---- projection 1: d -> 4d on the MXU (bf16 in, f32 accumulate) ----
    x = x_ref[...].reshape(M, D).astype(jnp.bfloat16)              # (M, D)
    h1 = jnp.dot(x, w1t_ref[...], preferred_element_type=jnp.float32)
    h1 = h1 + b1_ref[...]                                          # (M, C) f32

    # ---- stage into the flat margin scratch (lane-dense, 8-row aligned) ----
    zero_margin = jnp.zeros((PAD, C), jnp.float32)
    buf_ref[0:PAD, :] = zero_margin                        # top margin
    buf_ref[PAD + M:PAD + M + PAD, :] = zero_margin        # bottom margin
    buf_ref[PAD:PAD + M, :] = h1                           # interior (aligned)

    # ---- depthwise 3x3 conv: 9 shifted row-windows * (mask*tap), pure VPU ----
    # wmask[k] = boundary_mask(row) * conv_weight(channel) for tap k, so image
    # edges and batch-image boundaries inside the tile are zeroed correctly.
    acc = jnp.zeros((M, C), jnp.float32) + bconv_ref[...]          # conv bias
    for k, off in enumerate(OFFS):                                 # unrolled
        if off == 0:
            win = h1                                               # center tap
        else:
            win = buf_ref[PAD + off:PAD + off + M, :]              # (M, C)
        acc = acc + win * wmask_ref[k]

    # ---- gated activation: first channel half gates the second half ----
    gate = jnp.maximum(acc[:, :half], 0.0)
    y = (acc[:, half:] * gate).astype(jnp.bfloat16)                # (M, C//2)

    # ---- projection 2: 2d -> d on the MXU ----
    out = jnp.dot(y, w3t_ref[...], preferred_element_type=jnp.float32)
    out = out + b3_ref[...]
    o_ref[...] = out.reshape(BT, N, D).astype(o_ref.dtype)


def _pick_batch_tile(B, N, target_rows=256):
    """Largest divisor of B such that bt*N <= target_rows (at least 1)."""
    bt = max(1, min(B, max(1, target_rows // max(N, 1))))
    while B % bt:
        bt -= 1
    return bt


def mixffn_forward(x, w1, b1, conv_w, conv_b, w3, b3, h, w, *, bt=None):
    """x: (B, N, D) with N == h*w.  Parameter shapes follow the PyTorch module:
       w1 (4D, D), b1 (4D,), conv_w (4D, 1, 3, 3), conv_b (4D,), w3 (D, 2D), b3 (D,)."""
    B, N, D = x.shape
    C = w1.shape[0]
    assert N == h * w and C == 4 * D

    if bt is None:
        bt = _pick_batch_tile(B, N)
    assert B % bt == 0
    M = bt * N
    half = C // 2
    PAD = ((w + 1 + 7) // 8) * 8          # zero margin rows; >= max |tap offset| = w+1

    # ---- host-side parameter prep (one-time glue) ----
    w1t = jnp.transpose(w1).astype(jnp.bfloat16)          # (D, C)
    w3t = jnp.transpose(w3).astype(jnp.bfloat16)          # (C//2, D)
    b1_2d = b1.reshape(1, C).astype(jnp.float32)
    b3_2d = b3.reshape(1, D).astype(jnp.float32)
    bconv = conv_b.reshape(1, C).astype(jnp.float32)

    # Per-tap (boundary-mask * channel-weight) tensors, tiled over the bt images
    # in a block.  Masks are static -> built on the host, no int div/mod in-kernel.
    hh = np.arange(N) // w
    ww = np.arange(N) % w
    wk = jnp.transpose(conv_w.reshape(C, 3, 3), (1, 2, 0))        # (3, 3, C)
    offs, masks, taps = [], [], []
    for ki in (-1, 0, 1):
        for kj in (-1, 0, 1):
            offs.append(ki * w + kj)
            valid = ((hh + ki >= 0) & (hh + ki < h) &
                     (ww + kj >= 0) & (ww + kj < w))
            masks.append(np.tile(valid.astype(np.float32), bt))    # (M,)
            taps.append(wk[ki + 1, kj + 1])                        # (C,)
    mask_np = np.stack(masks, axis=0)                              # (9, M)
    wtap = jnp.stack(taps, axis=0)                                 # (9, C)
    wmask = (jnp.asarray(mask_np)[:, :, None] *
             wtap[:, None, :]).astype(jnp.float32)                 # (9, M, C)

    kernel = functools.partial(mixffn_kernel, BT=bt, N=N, D=D, C=C,
                               OFFS=tuple(offs), PAD=PAD)

    return pl.pallas_call(
        kernel,
        out_shape=jax.ShapeDtypeStruct((B, N, D), x.dtype),
        grid_spec=pltpu.PrefetchScalarGridSpec(
            num_scalar_prefetch=0,
            grid=(B // bt,),
            in_specs=[
                pl.BlockSpec((bt, N, D), lambda i: (i, 0, 0)),     # x tile
                pl.BlockSpec((D, C), lambda i: (0, 0)),            # w1.T (bf16)
                pl.BlockSpec((1, C), lambda i: (0, 0)),            # b1
                pl.BlockSpec((9, M, C), lambda i: (0, 0, 0)),      # mask*tap weights
                pl.BlockSpec((1, C), lambda i: (0, 0)),            # conv bias
                pl.BlockSpec((half, D), lambda i: (0, 0)),         # w3.T (bf16)
                pl.BlockSpec((1, D), lambda i: (0, 0)),            # b3
            ],
            out_specs=pl.BlockSpec((bt, N, D), lambda i: (i, 0, 0)),
            scratch_shapes=[pltpu.VMEM((PAD + M + PAD, C), jnp.float32)],
        ),
        compiler_params=pltpu.CompilerParams(
            dimension_semantics=("parallel",)),                    # v7x dual-TC
    )(x, w1t, b1_2d, wmask, bconv, w3t, b3_2d)


def mixffn_reference(x, w1, b1, conv_w, conv_b, w3, b3, h, w):
    """Pure-JAX f32 mirror of the PyTorch forward for correctness checking."""
    B, N, D = x.shape
    C = w1.shape[0]
    xh = x.reshape(B, h, w, D)
    h1 = jnp.einsum("bhwd,cd->bhwc", xh, w1) + b1
    pad = jnp.pad(h1, ((0, 0), (1, 1), (1, 1), (0, 0)))
    wk = jnp.transpose(conv_w.reshape(C, 3, 3), (1, 2, 0))
    acc = jnp.zeros_like(h1) + conv_b
    for di in range(3):
        for dj in range(3):
            acc = acc + pad[:, di:di + h, dj:dj + w, :] * wk[di, dj]
    half = C // 2
    y = acc[..., half:] * jax.nn.relu(acc[..., :half])
    out = jnp.einsum("bhwc,dc->bhwd", y, w3) + b3
    return out.reshape(B, N, D)


if __name__ == "__main__":
    # ModelConfig: d_model=32, sample_size=16, patch_size=4 -> h=w=4, n=16, dim_middle=128
    d_model = 32
    sample_size, patch_size = 16, 4
    h = w = sample_size // patch_size
    n = h * w
    dim_mid = 4 * d_model
    B = 2

    key = jax.random.PRNGKey(0)
    k1, k2, k3, k4, k5 = jax.random.split(key, 5)
    x = jax.random.normal(k1, (B, n, d_model), jnp.float32)
    w1 = jax.random.normal(k2, (dim_mid, d_model), jnp.float32)            # randn, like the module
    b1 = jnp.zeros((dim_mid,), jnp.float32)
    conv_w = jax.random.normal(k3, (dim_mid, 1, 3, 3), jnp.float32) * 0.1  # stand-in for Conv2d init
    conv_b = jax.random.normal(k4, (dim_mid,), jnp.float32) * 0.1
    w3 = jax.random.normal(k5, (d_model, dim_mid // 2), jnp.float32)
    b3 = jnp.zeros((d_model,), jnp.float32)

    out = mixffn_forward(x, w1, b1, conv_w, conv_b, w3, b3, h, w)
    out = jax.block_until_ready(out)

    ref = mixffn_reference(x, w1, b1, conv_w, conv_b, w3, b3, h, w)
    err = jnp.max(jnp.abs(out - ref)) / (jnp.max(jnp.abs(ref)) + 1e-6)
    assert out.shape == (B, n, d_model), out.shape
    # bf16 MXU inputs (f32 accumulate) vs. pure-f32 reference: 5e-2 tolerance.
    assert float(err) < 5e-2, f"max relative error too large: {float(err)}"
    print("KERNEL_OK")
</pallas_src>

<mosaic_0001>
module attributes {stable_mosaic.version = 11 : i64} {
  func.func @mixffn_kernel(%arg0: i32, %arg1: memref<2x16x32xf32, #tpu.memory_space<vmem>>, %arg2: memref<32x128xbf16, #tpu.memory_space<vmem>>, %arg3: memref<1x128xf32, #tpu.memory_space<vmem>>, %arg4: memref<9x32x128xf32, #tpu.memory_space<vmem>>, %arg5: memref<1x128xf32, #tpu.memory_space<vmem>>, %arg6: memref<64x32xbf16, #tpu.memory_space<vmem>>, %arg7: memref<1x32xf32, #tpu.memory_space<vmem>>, %arg8: memref<2x16x32xf32, #tpu.memory_space<vmem>>, %arg9: memref<48x128xf32, #tpu.memory_space<vmem>>) attributes {dimension_semantics = [#tpu.dimension_semantics<parallel>], iteration_bounds = array<i64: 1>, scalar_prefetch = 0 : i64, scratch_operands = 1 : i64, tpu.core_type = #tpu.core_type<tc>, window_params = [{transform_indices = @transform_0, window_bounds = array<i64: 2, 16, 32>}, {pipeline_mode = #tpu.pipeline_mode<synchronous>, transform_indices = @transform_1, window_bounds = array<i64: 32, 128>}, {pipeline_mode = #tpu.pipeline_mode<synchronous>, transform_indices = @transform_2, window_bounds = array<i64: 1, 128>}, {pipeline_mode = #tpu.pipeline_mode<synchronous>, transform_indices = @transform_3, window_bounds = array<i64: 9, 32, 128>}, {pipeline_mode = #tpu.pipeline_mode<synchronous>, transform_indices = @transform_4, window_bounds = array<i64: 1, 128>}, {pipeline_mode = #tpu.pipeline_mode<synchronous>, transform_indices = @transform_5, window_bounds = array<i64: 64, 32>}, {pipeline_mode = #tpu.pipeline_mode<synchronous>, transform_indices = @transform_6, window_bounds = array<i64: 1, 32>}, {transform_indices = @transform_7, window_bounds = array<i64: 2, 16, 32>}]} {
    %c0 = arith.constant 0 : index
    %c0_0 = arith.constant 0 : index
    %c0_1 = arith.constant 0 : index
    %0 = vector.load %arg1[%c0, %c0_0, %c0_1] : memref<2x16x32xf32, #tpu.memory_space<vmem>>, vector<2x16x32xf32>
    %1 = vector.shape_cast %0 : vector<2x16x32xf32> to vector<32x32xf32>
    %2 = arith.truncf %1 : vector<32x32xf32> to vector<32x32xbf16>
    %c0_2 = arith.constant 0 : index
    %c0_3 = arith.constant 0 : index
    %3 = vector.load %arg2[%c0_2, %c0_3] : memref<32x128xbf16, #tpu.memory_space<vmem>>, vector<32x128xbf16>
    %cst = arith.constant dense<0.000000e+00> : vector<32x128xf32>
    %4 = tpu.matmul %2, %3, %cst {dimension_numbers = #tpu.dot_dimension_numbers<[1], [0], [0], [1], [0, 0, 1, 1], [], []>} : vector<32x32xbf16>, vector<32x128xbf16>, vector<32x128xf32> -> vector<32x128xf32>
    %c0_4 = arith.constant 0 : index
    %c0_5 = arith.constant 0 : index
    %5 = vector.load %arg3[%c0_4, %c0_5] : memref<1x128xf32, #tpu.memory_space<vmem>>, vector<1x128xf32>
    %6 = vector.broadcast %5 : vector<1x128xf32> to vector<32x128xf32>
    %7 = arith.addf %4, %6 : vector<32x128xf32>
    %cst_6 = arith.constant 0.000000e+00 : f32
    %8 = vector.broadcast %cst_6 : f32 to vector<8x128xf32>
    %c0_7 = arith.constant 0 : index
    %c0_8 = arith.constant 0 : index
    %9 = vector.load %arg9[%c0_7, %c0_8] : memref<48x128xf32, #tpu.memory_space<vmem>>, vector<8x128xf32>
    tpu.vector_store %arg9[%c0_7, %c0_8], %8 {strides = array<i32>} : memref<48x128xf32, #tpu.memory_space<vmem>>, vector<8x128xf32>,
    %c40 = arith.constant 40 : index
    %c0_9 = arith.constant 0 : index
    %10 = vector.load %arg9[%c40, %c0_9] : memref<48x128xf32, #tpu.memory_space<vmem>>, vector<8x128xf32>
    tpu.vector_store %arg9[%c40, %c0_9], %8 {strides = array<i32>} : memref<48x128xf32, #tpu.memory_space<vmem>>, vector<8x128xf32>,
    %c8 = arith.constant 8 : index
    %c0_10 = arith.constant 0 : index
    %11 = vector.load %arg9[%c8, %c0_10] : memref<48x128xf32, #tpu.memory_space<vmem>>, vector<32x128xf32>
    tpu.vector_store %arg9[%c8, %c0_10], %7 {strides = array<i32>} : memref<48x128xf32, #tpu.memory_space<vmem>>, vector<32x128xf32>,
    %cst_11 = arith.constant 0.000000e+00 : f32
    %12 = vector.broadcast %cst_11 : f32 to vector<32x128xf32>
    %c0_12 = arith.constant 0 : index
    %c0_13 = arith.constant 0 : index
    %13 = vector.load %arg5[%c0_12, %c0_13] : memref<1x128xf32, #tpu.memory_space<vmem>>, vector<1x128xf32>
    %14 = vector.broadcast %13 : vector<1x128xf32> to vector<32x128xf32>
    %15 = arith.addf %12, %14 : vector<32x128xf32>
    %c3 = arith.constant 3 : index
    %c0_14 = arith.constant 0 : index
    %16 = vector.load %arg9[%c3, %c0_14] : memref<48x128xf32, #tpu.memory_space<vmem>>, vector<32x128xf32>
    %c0_15 = arith.constant 0 : index
    %c0_16 = arith.constant 0 : index
    %c0_17 = arith.constant 0 : index
    %17 = vector.load %arg4[%c0_15, %c0_16, %c0_17] : memref<9x32x128xf32, #tpu.memory_space<vmem>>, vector<1x32x128xf32>
    %18 = vector.shape_cast %17 : vector<1x32x128xf32> to vector<32x128xf32>
    %19 = arith.mulf %16, %18 : vector<32x128xf32>
    %20 = arith.addf %15, %19 : vector<32x128xf32>
    %c4 = arith.constant 4 : index
    %c0_18 = arith.constant 0 : index
    %21 = vector.load %arg9[%c4, %c0_18] : memref<48x128xf32, #tpu.memory_space<vmem>>, vector<32x128xf32>
    %c1 = arith.constant 1 : index
    %c0_19 = arith.constant 0 : index
    %c0_20 = arith.constant 0 : index
    %22 = vector.load %arg4[%c1, %c0_19, %c0_20] : memref<9x32x128xf32, #tpu.memory_space<vmem>>, vector<1x32x128xf32>
    %23 = vector.shape_cast %22 : vector<1x32x128xf32> to vector<32x128xf32>
    %24 = arith.mulf %21, %23 : vector<32x128xf32>
    %25 = arith.addf %20, %24 : vector<32x128xf32>
    %c5 = arith.constant 5 : index
    %c0_21 = arith.constant 0 : index
    %26 = vector.load %arg9[%c5, %c0_21] : memref<48x128xf32, #tpu.memory_space<vmem>>, vector<32x128xf32>
    %c2 = arith.constant 2 : index
    %c0_22 = arith.constant 0 : index
    %c0_23 = arith.constant 0 : index
    %27 = vector.load %arg4[%c2, %c0_22, %c0_23] : memref<9x32x128xf32, #tpu.memory_space<vmem>>, vector<1x32x128xf32>
    %28 = vector.shape_cast %27 : vector<1x32x128xf32> to vector<32x128xf32>
    %29 = arith.mulf %26, %28 : vector<32x128xf32>
    %30 = arith.addf %25, %29 : vector<32x128xf32>
    %c7 = arith.constant 7 : index
    %c0_24 = arith.constant 0 : index
    %31 = vector.load %arg9[%c7, %c0_24] : memref<48x128xf32, #tpu.memory_space<vmem>>, vector<32x128xf32>
    %c3_25 = arith.constant 3 : index
    %c0_26 = arith.constant 0 : index
    %c0_27 = arith.constant 0 : index
    %32 = vector.load %arg4[%c3_25, %c0_26, %c0_27] : memref<9x32x128xf32, #tpu.memory_space<vmem>>, vector<1x32x128xf32>
    %33 = vector.shape_cast %32 : vector<1x32x128xf32> to vector<32x128xf32>
    %34 = arith.mulf %31, %33 : vector<32x128xf32>
    %35 = arith.addf %30, %34 : vector<32x128xf32>
    %c4_28 = arith.constant 4 : index
    %c0_29 = arith.constant 0 : index
    %c0_30 = arith.constant 0 : index
    %36 = vector.load %arg4[%c4_28, %c0_29, %c0_30] : memref<9x32x128xf32, #tpu.memory_space<vmem>>, vector<1x32x128xf32>
    %37 = vector.shape_cast %36 : vector<1x32x128xf32> to vector<32x128xf32>
    %38 = arith.mulf %7, %37 : vector<32x128xf32>
    %39 = arith.addf %35, %38 : vector<32x128xf32>
    %c9 = arith.constant 9 : index
    %c0_31 = arith.constant 0 : index
    %40 = vector.load %arg9[%c9, %c0_31] : memref<48x128xf32, #tpu.memory_space<vmem>>, vector<32x128xf32>
    %c5_32 = arith.constant 5 : index
    %c0_33 = arith.constant 0 : index
    %c0_34 = arith.constant 0 : index
    %41 = vector.load %arg4[%c5_32, %c0_33, %c0_34] : memref<9x32x128xf32, #tpu.memory_space<vmem>>, vector<1x32x128xf32>
    %42 = vector.shape_cast %41 : vector<1x32x128xf32> to vector<32x128xf32>
    %43 = arith.mulf %40, %42 : vector<32x128xf32>
    %44 = arith.addf %39, %43 : vector<32x128xf32>
    %c11 = arith.constant 11 : index
    %c0_35 = arith.constant 0 : index
    %45 = vector.load %arg9[%c11, %c0_35] : memref<48x128xf32, #tpu.memory_space<vmem>>, vector<32x128xf32>
    %c6 = arith.constant 6 : index
    %c0_36 = arith.constant 0 : index
    %c0_37 = arith.constant 0 : index
    %46 = vector.load %arg4[%c6, %c0_36, %c0_37] : memref<9x32x128xf32, #tpu.memory_space<vmem>>, vector<1x32x128xf32>
    %47 = vector.shape_cast %46 : vector<1x32x128xf32> to vector<32x128xf32>
    %48 = arith.mulf %45, %47 : vector<32x128xf32>
    %49 = arith.addf %44, %48 : vector<32x128xf32>
    %c12 = arith.constant 12 : index
    %c0_38 = arith.constant 0 : index
    %50 = vector.load %arg9[%c12, %c0_38] : memref<48x128xf32, #tpu.memory_space<vmem>>, vector<32x128xf32>
    %c7_39 = arith.constant 7 : index
    %c0_40 = arith.constant 0 : index
    %c0_41 = arith.constant 0 : index
    %51 = vector.load %arg4[%c7_39, %c0_40, %c0_41] : memref<9x32x128xf32, #tpu.memory_space<vmem>>, vector<1x32x128xf32>
    %52 = vector.shape_cast %51 : vector<1x32x128xf32> to vector<32x128xf32>
    %53 = arith.mulf %50, %52 : vector<32x128xf32>
    %54 = arith.addf %49, %53 : vector<32x128xf32>
    %c13 = arith.constant 13 : index
    %c0_42 = arith.constant 0 : index
    %55 = vector.load %arg9[%c13, %c0_42] : memref<48x128xf32, #tpu.memory_space<vmem>>, vector<32x128xf32>
    %c8_43 = arith.constant 8 : index
    %c0_44 = arith.constant 0 : index
    %c0_45 = arith.constant 0 : index
    %56 = vector.load %arg4[%c8_43, %c0_44, %c0_45] : memref<9x32x128xf32, #tpu.memory_space<vmem>>, vector<1x32x128xf32>
    %57 = vector.shape_cast %56 : vector<1x32x128xf32> to vector<32x128xf32>
    %58 = arith.mulf %55, %57 : vector<32x128xf32>
    %59 = arith.addf %54, %58 : vector<32x128xf32>
    %60 = vector.extract_strided_slice %59 {offsets = [0, 0], sizes = [32, 64], strides = [1, 1]} : vector<32x128xf32> to vector<32x64xf32>
    %cst_46 = arith.constant 0.000000e+00 : f32
    %61 = vector.broadcast %cst_46 : f32 to vector<32x64xf32>
    %62 = arith.maximumf %60, %61 : vector<32x64xf32>
    %63 = vector.extract_strided_slice %59 {offsets = [0, 64], sizes = [32, 64], strides = [1, 1]} : vector<32x128xf32> to vector<32x64xf32>
    %64 = arith.mulf %63, %62 : vector<32x64xf32>
    %65 = arith.truncf %64 : vector<32x64xf32> to vector<32x64xbf16>
    %c0_47 = arith.constant 0 : index
    %c0_48 = arith.constant 0 : index
    %66 = vector.load %arg6[%c0_47, %c0_48] : memref<64x32xbf16, #tpu.memory_space<vmem>>, vector<64x32xbf16>
    %cst_49 = arith.constant dense<0.000000e+00> : vector<32x32xf32>
    %67 = tpu.matmul %65, %66, %cst_49 {dimension_numbers = #tpu.dot_dimension_numbers<[1], [0], [0], [1], [0, 0, 1, 1], [], []>} : vector<32x64xbf16>, vector<64x32xbf16>, vector<32x32xf32> -> vector<32x32xf32>
    %c0_50 = arith.constant 0 : index
    %c0_51 = arith.constant 0 : index
    %68 = vector.load %arg7[%c0_50, %c0_51] : memref<1x32xf32, #tpu.memory_space<vmem>>, vector<1x32xf32>
    %69 = vector.broadcast %68 : vector<1x32xf32> to vector<32x32xf32>
    %70 = arith.addf %67, %69 : vector<32x32xf32>
    %71 = vector.shape_cast %70 : vector<32x32xf32> to vector<2x16x32xf32>
    %c0_52 = arith.constant 0 : index
    %c0_53 = arith.constant 0 : index
    %c0_54 = arith.constant 0 : index
    %72 = vector.load %arg8[%c0_52, %c0_53, %c0_54] : memref<2x16x32xf32, #tpu.memory_space<vmem>>, vector<2x16x32xf32>
    tpu.vector_store %arg8[%c0_52, %c0_53, %c0_54], %71 {strides = array<i32>} : memref<2x16x32xf32, #tpu.memory_space<vmem>>, vector<2x16x32xf32>,
    return
  }
  func.func @transform_0(%arg0: i32) -> (i32, i32, i32) {
    %c0_i32 = arith.constant 0 : i32
    %c0_i32_0 = arith.constant 0 : i32
    %c0_i32_1 = arith.constant 0 : i32
    return %arg0, %c0_i32, %c0_i32_0 : i32, i32, i32
  }
  func.func @transform_1(%arg0: i32) -> (i32, i32) {
    %c0_i32 = arith.constant 0 : i32
    %c0_i32_0 = arith.constant 0 : i32
    %c0_i32_1 = arith.constant 0 : i32
    return %c0_i32, %c0_i32_0 : i32, i32
  }
  func.func @transform_2(%arg0: i32) -> (i32, i32) {
    %c0_i32 = arith.constant 0 : i32
    %c0_i32_0 = arith.constant 0 : i32
    %c0_i32_1 = arith.constant 0 : i32
    return %c0_i32, %c0_i32_0 : i32, i32
  }
  func.func @transform_3(%arg0: i32) -> (i32, i32, i32) {
    %c0_i32 = arith.constant 0 : i32
    %c0_i32_0 = arith.constant 0 : i32
    %c0_i32_1 = arith.constant 0 : i32
    %c0_i32_2 = arith.constant 0 : i32
    return %c0_i32, %c0_i32_0, %c0_i32_1 : i32, i32, i32
  }
  func.func @transform_4(%arg0: i32) -> (i32, i32) {
    %c0_i32 = arith.constant 0 : i32
    %c0_i32_0 = arith.constant 0 : i32
    %c0_i32_1 = arith.constant 0 : i32
    return %c0_i32, %c0_i32_0 : i32, i32
  }
  func.func @transform_5(%arg0: i32) -> (i32, i32) {
    %c0_i32 = arith.constant 0 : i32
    %c0_i32_0 = arith.constant 0 : i32
    %c0_i32_1 = arith.constant 0 : i32
    return %c0_i32, %c0_i32_0 : i32, i32
  }
  func.func @transform_6(%arg0: i32) -> (i32, i32) {
    %c0_i32 = arith.constant 0 : i32
    %c0_i32_0 = arith.constant 0 : i32
    %c0_i32_1 = arith.constant 0 : i32
    return %c0_i32, %c0_i32_0 : i32, i32
  }
  func.func @transform_7(%arg0: i32) -> (i32, i32, i32) {
    %c0_i32 = arith.constant 0 : i32
    %c0_i32_0 = arith.constant 0 : i32
    %c0_i32_1 = arith.constant 0 : i32
    return %arg0, %c0_i32, %c0_i32_0 : i32, i32, i32
  }
}

</mosaic_0001>

<bundles_post_ra>
// kernel: tpu_custom_call.1
= control target key start
LH: loop header
LB: loop body
LE: loop exit
PB: predicated region body
PF: predicated region fallthrough
CT: control target
= control target key end

     0   :  { %12 = vsyncpa [#allocation4], 0  ;;  %s680_s0 = inlined_call_operand.vmem [shape: f32[2,16,32], index: 0, kind: input, shape index: {}]   ;;  %s681_s1 = inlined_call_operand.vmem [shape: bf16[32,128], index: 1, kind: input, shape index: {}]   ;;  %s682_s2 = inlined_call_operand.vmem [shape: f32[1,128], index: 2, kind: input, shape index: {}]   ;;  %s683_s3 = inlined_call_operand.hbm [shape: f32[9,32,128], index: 3, kind: input, shape index: {}]   ;;  %s684_s4 = inlined_call_operand.vmem [shape: f32[1,128], index: 4, kind: input, shape index: {}]   ;;  %s685_s5 = inlined_call_operand.vmem [shape: bf16[64,32], index: 5, kind: input, shape index: {}]   ;;  %s686_s6 = inlined_call_operand.vmem [shape: f32[1,32], index: 6, kind: input, shape index: {}]   ;;  %s687_s7 = inlined_call_operand.hbm [shape: f32[2,16,32], index: 7, kind: output, shape index: {}]  }
   0x1   :  { %13 = vsyncpa [#allocation5], 0  ;;  %s527_s24 = smov [#allocation3]  }
   0x2   :  { %s25_s25 = sshll.u32 %s527_s24, 4  ;;  %s26_s25 = int_to_ptr.vmem [resolvable:$true] %s25_s25 }
   0x3   :  { %s491_s26 = scalar_lea.vmem %s26_s25, 4608  ;;  %p496_p1 = scmp.lt.s32.totalorder %s26_s25, %s26_s25 }
   0x4   :  { %p492_p0 = scmp.ne.s32.totalorder %s26_s25, %s491_s26  ;;  %p497_p2 = scmp.lt.s32.totalorder %s491_s26, %s491_s26 }
   0x6   :  { %p498_p3 = por %p497_p2, %p496_p1 }
   0x8   :  { %p499_p4 = pnand %p498_p3, %p492_p0 }
   0xa   :  { %502 = shalt.err (!%p499_p4)
}
   0xb   :  { %s528_s27 = smov 128   ;;  %s529_s28 = smov 8  }
   0xc   :  { %31 = dma.hbm_to_vmem [thread:$0]  %s683_s3, 4608, %s26_s25, [#allocation4], %s528_s27, %s528_s27, %s529_s28  }
   0xd   :  { %523 = dma.done.wait [#allocation4], 4608  }
   0xe   :  { %524 = vsyncadd [#allocation4], 4294962688  ;;  %v477_v0 = vld [vmem:[%s681_s1 + $0x8] sm:$0xff]   ;;  %v478_v1 = vld [vmem:[%s681_s1] sm:$0xff]   ;;  %vm71_vm0 = vcmask 261120   ;;  %v530_v8 = vmov 0.0  }
   0xf   :  { %451 = vmatprep.subr.bf16.mxu0 %v477_v0  ;;  %v42_v2 = vld [vmem:[%s680_s0] sm:$0xff]  ;;  %v43_v3 = vld [vmem:[%s680_s0 + $0x8] sm:$0xff]  ;;  %v44_v4 = vld [vmem:[%s680_s0 + $0x10] sm:$0xff]  ;;  %127 = vst [vmem:[#allocation2] sm:$0xff] %v530_v8  ;;  %vm351_vm1 = vcmask 523264   ;;  %s532_s8 = smov [#allocation6]  }
  0x10   :  { %452 = vmatpush3.bf16.msra.mxu0 %v477_v0  ;;  %v46_v5 = vpack.c.bf16 %v43_v3, %v42_v2  ;;  %v45_v6 = vld [vmem:[%s680_s0 + $0x18] sm:$0xff]  ;;  %128 = vst [vmem:[#allocation2 + $0x28] sm:$0xff] %v530_v8  ;;  %v428_v9 = vld [vmem:[%s682_s2] ss:$0 sm:$0xff]  ;;  %v145_v19 = vld [vmem:[#allocation3] sm:$0xff]  ;;  %s416_s9 = sshll.u32 %s532_s8, 4  ;;  %s417_s9 = int_to_ptr.vmem [resolvable:$true] %s416_s9 }
  0x11   :  { %453 = vmatprep.subr.bf16.mxu0 %v478_v1  ;;  %v47_v7 = vpack.c.bf16 %v45_v6, %v44_v4  ;;  %v433_v18 = vld [vmem:[%s684_s4] ss:$0 sm:$0xff]  ;;  %v162_v20 = vld [vmem:[#allocation3 + $0x20] sm:$0xff]  ;;  %v148_v22 = vld [vmem:[#allocation3 + $0x18] sm:$0xff]  ;;  %s531_s4 = smov 64   ;;  %p508_p6 = scmp.lt.s32.totalorder %s417_s9, %s417_s9 }
  0x12   :  { %455 = vmatprep.mubr.msk.bf16.mxu0 %vm71_vm0, %v46_v5  ;;  %v179_v21 = vld [vmem:[#allocation3 + $0x40] sm:$0xff]  ;;  %v165_v23 = vld [vmem:[#allocation3 + $0x38] sm:$0xff]  ;;  %v146_v26 = vld [vmem:[#allocation3 + $0x8] sm:$0xff] }
  0x13   :  { %v196_v29 = vld [vmem:[#allocation3 + $0x60] sm:$0xff]  ;;  %v182_v30 = vld [vmem:[#allocation3 + $0x58] sm:$0xff]  ;;  %v147_v31 = vld [vmem:[#allocation3 + $0x10] sm:$0xff] }
  0x14   :  { %454 = vmatpush3.bf16.msra.mxu0 %v478_v1  ;;  %v163_v32 = vld [vmem:[#allocation3 + $0x28] sm:$0xff]  ;;  %v164_v35 = vld [vmem:[#allocation3 + $0x30] sm:$0xff]  ;;  %v209_v39 = vld [vmem:[#allocation3 + $0x80] sm:$0xff] }
  0x15   :  { %v199_v42 = vld [vmem:[#allocation3 + $0x78] sm:$0xff]  ;;  %v180_v43 = vld [vmem:[#allocation3 + $0x48] sm:$0xff]  ;;  %v181_v5 = vld [vmem:[#allocation3 + $0x50] sm:$0xff] }
  0x16   :  { %v212_v58 = vld [vmem:[#allocation3 + $0x98] sm:$0xff]  ;;  %v197_v61 = vld [vmem:[#allocation3 + $0x68] sm:$0xff] }
  0x17   :  { %456 = vmatmul.mubr.msk.bf16.vlgmr.msra.gmra.mxu0 %vm71_vm0, %v47_v7  ;;  %v210_v3 = vld [vmem:[#allocation3 + $0x88] sm:$0xff]  ;;  %v229_v8 = vld [vmem:[#allocation3 + $0xb8] sm:$0xff] }
  0xd7   :  { %v457_v10 = vpop.f32.mrf.mxu0 }
  0xd8   :  { %v602_v11 = vadd.f32 %v457_v10, %v428_v9 }
  0xd9   :  { %v112_v12 = vpop.f32.mrf.mxu0 }
  0xda   :  { %131 = vst [vmem:[#allocation2 + $0x18] sm:$0xff] %v602_v11  ;;  %v113_v13 = vadd.f32 %v428_v9, %v112_v12  ;;  %v226_v12 = vld [vmem:[#allocation3 + $0xa0] sm:$0xff] }
  0xdb   :  { %v458_v14 = vpop.f32.mrf.mxu0 }
  0xdc   :  { %129 = vst [vmem:[#allocation2 + $0x8] sm:$0xff] %v113_v13  ;;  %v605_v15 = vadd.f32 %v458_v14, %v428_v9  ;;  %v213_v6 = vmul.f32 %v209_v39, %v113_v13  ;;  %v211_v13 = vld [vmem:[#allocation3 + $0x90] sm:$0xff] }
  0xdd   :  { %v115_v16 = vpop.f32.mrf.mxu0 }
  0xde   :  { %132 = vst [vmem:[#allocation2 + $0x20] sm:$0xff] %v605_v15  ;;  %v608_v17 = vadd.f32 %v428_v9, %v115_v16 }
  0xe0   :  { %130 = vst [vmem:[#allocation2 + $0x10] sm:$0xff] %v608_v17 }
  0xe3   :  { %v141_v24 = vld [vmem:[#allocation2 + $0x3] sm:$0xff] }
  0xe4   :  { %v157_v25 = vld [vmem:[#allocation2 + $0x4] sm:$0xff]  ;;  %v149_v27 = vmul.f32 %v145_v19, %v141_v24 }
  0xe5   :  { %v174_v28 = vld [vmem:[#allocation2 + $0x5] sm:$0xff]  ;;  %v614_v33 = vld [vmem:[#allocation2 + $0x1b] sm:$0xff]  ;;  %v166_v37 = vmul.f32 %v162_v20, %v157_v25  ;;  %v240_v25 = vld [vmem:[#allocation3 + $0xc0] sm:$0xff] }
  0xe6   :  { %v616_v34 = vld [vmem:[#allocation2 + $0x1c] sm:$0xff]  ;;  %v153_v36 = vadd.f32 %v433_v18, %v149_v27  ;;  %v191_v38 = vld [vmem:[#allocation2 + $0x7] sm:$0xff]  ;;  %v152_v40 = vmul.f32 %v148_v22, %v614_v33  ;;  %v183_v44 = vmul.f32 %v179_v21, %v174_v28 }
  0xe7   :  { %v619_v41 = vld [vmem:[#allocation2 + $0x1d] sm:$0xff]  ;;  %v169_v45 = vmul.f32 %v165_v23, %v616_v34  ;;  %v142_v46 = vld [vmem:[#allocation2 + $0xb] sm:$0xff]  ;;  %v622_v47 = vld [vmem:[#allocation2 + $0x13] sm:$0xff]  ;;  %v200_v56 = vmul.f32 %v196_v29, %v191_v38 }
  0xe8   :  { %v624_v48 = vld [vmem:[#allocation2 + $0xc] sm:$0xff]  ;;  %v170_v49 = vadd.f32 %v166_v37, %v153_v36  ;;  %v156_v50 = vadd.f32 %v433_v18, %v152_v40  ;;  %v194_v51 = vld [vmem:[#allocation2 + $0x1f] sm:$0xff]  ;;  %v150_v52 = vmul.f32 %v146_v26, %v142_v46  ;;  %v151_v53 = vmul.f32 %v147_v31, %v622_v47  ;;  %v627_v54 = vld [vmem:[#allocation2 + $0x14] sm:$0xff] }
  0xe9   :  { %v629_v55 = vld [vmem:[#allocation2 + $0xd] sm:$0xff]  ;;  %v186_v57 = vmul.f32 %v182_v30, %v619_v41  ;;  %v167_v59 = vmul.f32 %v163_v32, %v624_v48  ;;  %v168_v60 = vmul.f32 %v164_v35, %v627_v54  ;;  %v634_v4 = vld [vmem:[#allocation2 + $0x15] sm:$0xff]  ;;  %v203_v7 = vmul.f32 %v199_v42, %v194_v51  ;;  %v224_v19 = vld [vmem:[#allocation2 + $0x21] sm:$0xff] }
  0xea   :  { %v187_v62 = vadd.f32 %v183_v44, %v170_v49  ;;  %v173_v63 = vadd.f32 %v169_v45, %v156_v50  ;;  %v154_v0 = vadd.f32 %v433_v18, %v150_v52  ;;  %v155_v1 = vadd.f32 %v433_v18, %v151_v53  ;;  %v192_v2 = vld [vmem:[#allocation2 + $0xf] sm:$0xff]  ;;  %v193_v22 = vld [vmem:[#allocation2 + $0x17] sm:$0xff]  ;;  %v198_v23 = vld [vmem:[#allocation3 + $0x70] sm:$0xff] }
  0xeb   :  { %v184_v9 = vmul.f32 %v180_v43, %v629_v55  ;;  %v221_v10 = vld [vmem:[#allocation2 + $0x9] sm:$0xff]  ;;  %v216_v18 = vmul.f32 %v212_v58, %v605_v15  ;;  %v201_v24 = vmul.f32 %v197_v61, %v192_v2  ;;  %v185_v26 = vmul.f32 %v181_v5, %v634_v4  ;;  %v222_v30 = vld [vmem:[#allocation2 + $0x11] sm:$0xff]  ;;  %v223_v49 = vld [vmem:[#allocation2 + $0x19] sm:$0xff] }
  0xec   :  { %v204_v14 = vadd.f32 %v200_v56, %v187_v62  ;;  %v190_v16 = vadd.f32 %v186_v57, %v173_v63  ;;  %v171_v20 = vadd.f32 %v167_v59, %v154_v0  ;;  %v172_v21 = vadd.f32 %v168_v60, %v155_v1  ;;  %v227_v31 = vld [vmem:[#allocation3 + $0xa8] sm:$0xff]  ;;  %v243_v36 = vld [vmem:[#allocation3 + $0xd8] sm:$0xff]  ;;  %v254_v38 = vld [vmem:[#allocation3 + $0xe0] sm:$0xff] }
  0xed   :  { %v230_v32 = vmul.f32 %v226_v12, %v221_v10  ;;  %v233_v35 = vmul.f32 %v229_v8, %v224_v19  ;;  %v214_v37 = vmul.f32 %v210_v3, %v608_v17  ;;  %v202_v40 = vmul.f32 %v198_v23, %v193_v22  ;;  %v238_v15 = vld [vmem:[#allocation2 + $0x23] sm:$0xff]  ;;  %v241_v53 = vld [vmem:[#allocation3 + $0xc8] sm:$0xff]  ;;  %v268_v56 = vld [vmem:[#allocation3 + $0x100] sm:$0xff] }
  0xee   :  { %v217_v27 = vadd.f32 %v213_v6, %v204_v14  ;;  %v207_v28 = vadd.f32 %v203_v7, %v190_v16  ;;  %v188_v29 = vadd.f32 %v184_v9, %v171_v20  ;;  %v189_v39 = vadd.f32 %v185_v26, %v172_v21  ;;  %v228_v50 = vld [vmem:[#allocation3 + $0xb0] sm:$0xff]  ;;  %v255_v1 = vld [vmem:[#allocation3 + $0xe8] sm:$0xff]  ;;  %v257_v7 = vld [vmem:[#allocation3 + $0xf8] sm:$0xff] }
  0xef   :  { %v244_v45 = vmul.f32 %v240_v25, %v142_v46  ;;  %v215_v51 = vmul.f32 %v211_v13, %v602_v11  ;;  %v231_v52 = vmul.f32 %v227_v31, %v222_v30  ;;  %v258_v17 = vmul.f32 %v254_v38, %v624_v48  ;;  %v242_v61 = vld [vmem:[#allocation3 + $0xd0] sm:$0xff]  ;;  %v269_v12 = vld [vmem:[#allocation3 + $0x108] sm:$0xff] }
  0xf0   :  { %v220_v42 = vadd.f32 %v216_v18, %v207_v28  ;;  %v205_v43 = vadd.f32 %v201_v24, %v188_v29  ;;  %v234_v44 = vadd.f32 %v230_v32, %v217_v27  ;;  %v206_v57 = vadd.f32 %v202_v40, %v189_v39  ;;  %v256_v5 = vld [vmem:[#allocation3 + $0xf0] sm:$0xff]  ;;  %v271_v24 = vld [vmem:[#allocation3 + $0x118] sm:$0xff] }
  0xf1   :  { %v247_v62 = vmul.f32 %v243_v36, %v238_v15  ;;  %v232_v0 = vmul.f32 %v228_v50, %v223_v49  ;;  %v245_v46 = vmul.f32 %v241_v53, %v622_v47  ;;  %v272_v11 = vmul.f32 %v268_v56, %v629_v55  ;;  %v252_v6 = vld [vmem:[#allocation2 + $0x24] sm:$0xff]  ;;  %v434_v50 = vld [vmem:[%s686_s6] ss:$0 sm:$0xff]  ;;  %s503_s6 = scalar_lea.vmem %s417_s9, 512 }
  0xf2   :  { %v237_v58 = vadd.f32 %v233_v35, %v220_v42  ;;  %v218_v59 = vadd.f32 %v214_v37, %v205_v43  ;;  %v248_v60 = vadd.f32 %v244_v45, %v234_v44  ;;  %v219_v63 = vadd.f32 %v215_v51, %v206_v57  ;;  %v270_v16 = vld [vmem:[#allocation3 + $0x110] sm:$0xff]  ;;  %p504_p5 = scmp.ne.s32.totalorder %s417_s9, %s503_s6  ;;  %p509_p7 = scmp.lt.s32.totalorder %s503_s6, %s503_s6 }
  0xf3   :  { %v246_v10 = vmul.f32 %v242_v61, %v614_v33  ;;  %v259_v19 = vmul.f32 %v255_v1, %v627_v54  ;;  %v260_v21 = vmul.f32 %v256_v5, %v616_v34  ;;  %v261_v47 = vmul.f32 %v257_v7, %v252_v6  ;;  %v266_v18 = vld [vmem:[#allocation2 + $0x25] sm:$0xff]  ;;  %v479_v54 = vld [vmem:[%s685_s5 + $0x18] sm:$0xff]   ;;  %v480_v34 = vld [vmem:[%s685_s5 + $0x10] sm:$0xff]  }
  0xf4   :  { %v235_v2 = vadd.f32 %v231_v52, %v218_v59  ;;  %v262_v3 = vadd.f32 %v258_v17, %v248_v60  ;;  %v251_v8 = vadd.f32 %v247_v62, %v237_v58  ;;  %v236_v9 = vadd.f32 %v232_v0, %v219_v63  ;;  %459 = vmatprep.subr.bf16.mxu1 %v479_v54  ;;  %v482_v32 = vld [vmem:[%s685_s5] sm:$0xff]   ;;  %p510_p8 = por %p509_p7, %p508_p6 }
  0xf5   :  { %v273_v55 = vmul.f32 %v269_v12, %v634_v4  ;;  %v274_v26 = vmul.f32 %v270_v16, %v619_v41  ;;  %v275_v4 = vmul.f32 %v271_v24, %v266_v18  ;;  %460 = vmatpush3.bf16.msra.mxu1 %v479_v54  ;;  %v481_v41 = vld [vmem:[%s685_s5 + $0x8] sm:$0xff]  }
  0xf6   :  { %v249_v48 = vadd.f32 %v245_v46, %v235_v2  ;;  %v276_v14 = vadd.f32 %v272_v11, %v262_v3  ;;  %v250_v20 = vadd.f32 %v246_v10, %v236_v9  ;;  %v265_v33 = vadd.f32 %v261_v47, %v251_v8  ;;  %461 = vmatprep.subr.bf16.mxu1 %v480_v34  ;;  %p511_p9 = pnand %p510_p8, %p504_p5 }
  0xf8   :  { %v280_v22 = vmax.f32 %v276_v14, 0.0  ;;  %v263_v23 = vadd.f32 %v259_v19, %v249_v48  ;;  %v264_v25 = vadd.f32 %v260_v21, %v250_v20  ;;  %v279_v30 = vadd.f32 %v275_v4, %v265_v33 }
  0xf9   :  { %462 = vmatpush3.bf16.msra.mxu1 %v480_v34 }
  0xfa   :  { %288 = vrot.lane.b32.xlu0 %v280_v22, %s531_s4  ;;  %v277_v13 = vadd.f32 %v273_v55, %v263_v23  ;;  %v278_v27 = vadd.f32 %v274_v26, %v264_v25  ;;  %v283_v31 = vmax.f32 %v279_v30, 0.0  ;;  %463 = vmatprep.subr.bf16.mxu1 %v481_v41 }
  0xfc   :  { %v281_v28 = vmax.f32 %v277_v13, 0.0  ;;  %v282_v29 = vmax.f32 %v278_v27, 0.0 }
  0xfd   :  { %464 = vmatpush3.bf16.msra.mxu1 %v481_v41 }
  0xfe   :  { %290 = vrot.lane.b32.xlu0 %v281_v28, %s531_s4  ;;  %292 = vrot.lane.b32.xlu1 %v282_v29, %s531_s4 }
  0xff   :  { %465 = vmatprep.subr.bf16.mxu1 %v482_v32 }
 0x101   :  { %466 = vmatpush3.bf16.msra.mxu1 %v482_v32 }
 0x102   :  { %294 = vrot.lane.b32.xlu1 %v283_v31, %s531_s4 }
 0x16c   :  { %v289_v35 = vpop.permute.xlu0 %288 }
 0x16d   :  { %v300_v37 = vmul.f32 %v289_v35, %v276_v14 }
 0x170   :  { %v291_v36 = vpop.permute.xlu0 %290  ;;  %v293_v38 = vpop.permute.xlu1 %292 }
 0x171   :  { %v301_v39 = vmul.f32 %v291_v36, %v277_v13  ;;  %v302_v15 = vmul.f32 %v293_v38, %v278_v27 }
 0x173   :  { %v304_v40 = vpack.c.bf16 %v301_v39, %v300_v37 }
 0x174   :  { %v295_v42 = vpop.permute.xlu1 %294 }
 0x175   :  { %323 = vrot.lane.b32.xlu0 %v304_v40, %s531_s4  ;;  %v303_v43 = vmul.f32 %v295_v42, %v279_v30 }
 0x177   :  { %v305_v44 = vpack.c.bf16 %v303_v43, %v302_v15 }
 0x179   :  { %325 = vrot.lane.b32.xlu1 %v305_v44, %s531_s4 }
 0x1e7   :  { %v324_v45 = vpop.permute.xlu0 %323 }
 0x1e8   :  { %467 = vmatprep.mubr.msk.bf16.mxu1 %vm351_vm1, %v324_v45 }
 0x1eb   :  { %v326_v49 = vpop.permute.xlu1 %325 }
 0x1ec   :  { %468 = vmatmul.mubr.msk.bf16.vlgmr.msra.gmra.mxu1 %vm351_vm1, %v326_v49 }
 0x2ac   :  { %v469_v51 = vpop.f32.mrf.mxu1 }
 0x2ad   :  { %v401_v52 = vadd.f32 %v469_v51, %v434_v50 }
 0x2ae   :  { %v392_v53 = vpop.f32.mrf.mxu1 }
 0x2af   :  { %409 = vst.msk [vmem:[#allocation6 + $0x10] sm:$0xff] %vm71_vm0, %v401_v52  ;;  %v393_v56 = vadd.f32 %v434_v50, %v392_v53 }
 0x2b0   :  { %v470_v57 = vpop.f32.mrf.mxu1 }
 0x2b1   :  { %407 = vst.msk [vmem:[#allocation6] sm:$0xff] %vm71_vm0, %v393_v56  ;;  %v404_v58 = vadd.f32 %v470_v57, %v434_v50 }
 0x2b2   :  { %v395_v59 = vpop.f32.mrf.mxu1 }
 0x2b3   :  { %410 = vst.msk [vmem:[#allocation6 + $0x18] sm:$0xff] %vm71_vm0, %v404_v58  ;;  %v396_v60 = vadd.f32 %v434_v50, %v395_v59 }
 0x2b5   :  { %408 = vst.msk [vmem:[#allocation6 + $0x8] sm:$0xff] %vm71_vm0, %v396_v60 }
 0x2b6   :  { %514 = shalt.err (!%p511_p9)
}
 0x2b7   :  { %422 = dma.vmem_to_hbm [thread:$0]  %s417_s9, 512, %s687_s7, [#allocation5], %s528_s27, %s528_s27, %s529_s28  }
 0x2b8   :  { %525 = dma.done.wait [#allocation5], 512  }
 0x2b9   :  { %526 = vsyncadd [#allocation5], 4294966784 }
 0x2ba   :  { %426 = vsyncpa [#allocation4], 1 }
 0x2bb   :  { %427 = vsyncpa [#allocation5], 1 }

</bundles_post_ra>
